<compile_context>
chip_gen: v7x
topology: tpu7x:2x2x1
jax: 0.10.0
libtpu: 0.0.40
codegen_flags: <defaults>
</compile_context>

<pallas_src>
import functools

import jax
import jax.numpy as jnp
from jax import lax
from jax.experimental import pallas as pl
from jax.experimental.pallas import tpu as pltpu

# Deterministic stand-ins for the dataset-derived normalization constants.
X_MIN = 1.0
X_MAX = 100.0


def _loss_kernel(p_ref, t_ref, o_ref, *, rc):
    """Grid = (C, NI): C 'parallel' slices x NI sequential reduction steps.

    The output block's index map ignores the i axis, so o_ref stays resident
    in VMEM across the whole reduction: zero it at i==0, += every step.
    """
    i = pl.program_id(1)

    @pl.when(i == 0)
    def _():
        o_ref[...] = jnp.zeros_like(o_ref)

    tm, d = p_ref.shape
    nchunks = tm // rc

    def chunk_partial(start):
        # Upcast (bf16 or f32 inputs) to f32 for the math / accumulation.
        p = p_ref[pl.ds(start, rc), :].astype(jnp.float32)
        t = t_ref[pl.ds(start, rc), :].astype(jnp.float32)
        # norm_to_original(t, x_min, x_max) = t * (x_max - x_min) + x_min
        denom = t * (X_MAX - X_MIN) + X_MIN
        diff = p - t
        # EUP reciprocal instead of a multi-op VPU divide sequence.
        val = diff * diff * pl.reciprocal(denom, approx=False)
        # Fold rc rows onto a vreg-shaped (8, d) partial: pure VPU adds,
        # no cross-lane XLU reduce, no masked (1,1) scalar RMW.
        return val.reshape(rc // 8, 8, d).sum(axis=0)

    if nchunks == 1:
        acc = chunk_partial(0)
    else:
        def body(c, carry):
            start = pl.multiple_of(c * rc, rc)
            return carry + chunk_partial(start)

        acc = lax.fori_loop(0, nchunks, body,
                            jnp.zeros((8, d), jnp.float32),
                            unroll=(nchunks <= 16))

    o_ref[...] += acc[None]


def _default_cores():
    # v7x has 2 TensorCores per chip sharing ~3.2 TB/s HBM; v5e/v6e have 1.
    try:
        kind = jax.devices()[0].device_kind.lower()
    except Exception:
        return 1
    return 2 if "v7" in kind else 1


def _choose_tm(n, d, itemsize, cores, target_block_bytes, row_align):
    """Largest row-aligned tm <= budget that divides N with nb % cores == 0."""
    cap = max(row_align,
              (target_block_bytes // (d * itemsize)) // row_align * row_align)
    tm = min(cap, n)
    tm -= tm % row_align
    while tm >= row_align:
        if n % tm == 0 and (n // tm) % cores == 0:
            return tm
        tm -= row_align
    return None


def loss_fn(preds, targets, *, cores=None, target_block_bytes=2 * 1024 * 1024,
            vmem_limit_bytes=None):
    """mean((p - t)^2 / denorm(t)) computed with a Pallas TPU kernel."""
    assert preds.shape == targets.shape
    assert preds.dtype == targets.dtype
    N, D = preds.shape
    assert N % 8 == 0 and D % 128 == 0, "shapes must tile to (8,128)"

    itemsize = preds.dtype.itemsize
    # Sub-32-bit dtypes pack along sublanes: keep row blocks 16-aligned for bf16.
    row_align = 8 if itemsize >= 4 else 16

    if cores is None:
        cores = _default_cores()
    cores = max(1, int(cores))

    # 1-4 MiB per input block keeps the stream near the HBM roofline (~85%+);
    # at the 2 MiB default, 2 inputs x 2 pipeline buffers (~8 MiB) fits every
    # generation's scoped-VMEM default (16 MiB v5e, 32 MiB v6e/v7x). Larger
    # budgets (e.g. big D) raise vmem_limit_bytes below.
    tm = _choose_tm(N, D, itemsize, cores, target_block_bytes, row_align)
    if tm is None:                       # cannot split block count across cores
        cores = 1
        tm = _choose_tm(N, D, itemsize, 1, target_block_bytes, row_align)
    if tm is None:                       # N not row-aligned: one full-extent block
        cores, tm = 1, N

    nb = N // tm
    C = cores
    ni = nb // C

    # Row-chunk size for the in-kernel fold (bounds f32 temporaries to <=256 rows).
    rc = tm
    for cand in (256, 128, 64, 32, 16, 8):
        if tm % cand == 0:
            rc = cand
            break

    block_bytes = tm * D * itemsize
    working_set = 2 * 2 * block_bytes + 2 * 8 * D * 4   # in double-buffers + out
    compiler_kwargs = dict(dimension_semantics=("parallel", "arbitrary"))
    if vmem_limit_bytes is None and working_set > 12 * 1024 * 1024:
        vmem_limit_bytes = working_set + (4 << 20)       # headroom above v5e default
    if vmem_limit_bytes is not None:
        compiler_kwargs["vmem_limit_bytes"] = int(vmem_limit_bytes)

    bytes_in = 2 * N * D * itemsize
    cost = pl.CostEstimate(
        flops=5 * N * D,
        transcendentals=N * D,
        bytes_accessed=bytes_in + C * 8 * D * 4,
    )

    partials = pl.pallas_call(
        functools.partial(_loss_kernel, rc=rc),
        out_shape=jax.ShapeDtypeStruct((C, 8, D), jnp.float32),
        grid_spec=pltpu.PrefetchScalarGridSpec(
            num_scalar_prefetch=0,
            grid=(C, ni),
            in_specs=[
                pl.BlockSpec((tm, D), lambda c, i: (c * ni + i, 0)),
                pl.BlockSpec((tm, D), lambda c, i: (c * ni + i, 0)),
            ],
            out_specs=pl.BlockSpec((1, 8, D), lambda c, i: (c, 0, 0)),
        ),
        compiler_params=pltpu.CompilerParams(**compiler_kwargs),
        cost_estimate=cost,
    )(preds, targets)

    # Tiny final reduce (C*8*D elements) + compile-time 1/(N*D) scale in JAX.
    return jnp.sum(partials) * (1.0 / (N * D))


def loss_ref(preds, targets):
    p = preds.astype(jnp.float32)
    t = targets.astype(jnp.float32)
    denom = t * (X_MAX - X_MIN) + X_MIN
    return jnp.mean((p - t) ** 2 / denom)


if __name__ == "__main__":
    key = jax.random.PRNGKey(0)

    # (N, D, dtype, kwargs): tiny single-block f32 path, bf16 budget-tiled
    # reduction path, explicit 2-slice (v7x-style) path, BERT-hidden-sized bf16.
    cases = [
        (16, 128, jnp.float32, {}),
        (2048, 256, jnp.bfloat16, dict(target_block_bytes=256 * 1024)),
        (2048, 256, jnp.bfloat16, dict(target_block_bytes=256 * 1024, cores=2)),
        (512, 768, jnp.bfloat16, {}),
    ]
    for idx, (N, D, dt, kw) in enumerate(cases):
        kp, kt = jax.random.split(jax.random.fold_in(key, idx))
        targets = jax.random.uniform(kt, (N, D), dtype=jnp.float32)
        preds = targets + 0.1 * jax.random.normal(kp, (N, D), dtype=jnp.float32)
        targets = targets.astype(dt)
        preds = preds.astype(dt)

        out = loss_fn(preds, targets, **kw)
        out = jax.block_until_ready(out)

        ref = loss_ref(preds, targets)
        assert jnp.allclose(out, ref, rtol=2e-5, atol=1e-6), (N, D, dt, out, ref)

    print("KERNEL_OK")
</pallas_src>

<mosaic_0001>
module attributes {stable_mosaic.version = 11 : i64} {
  func.func @_loss_kernel(%arg0: i32, %arg1: i32, %arg2: memref<16x128xf32, #tpu.memory_space<vmem>>, %arg3: memref<16x128xf32, #tpu.memory_space<vmem>>, %arg4: memref<1x8x128xf32, #tpu.memory_space<vmem>>) attributes {dimension_semantics = [#tpu.dimension_semantics<parallel>, #tpu.dimension_semantics<arbitrary>], iteration_bounds = array<i64: 1, 1>, scalar_prefetch = 0 : i64, scratch_operands = 0 : i64, tpu.core_type = #tpu.core_type<tc>, window_params = [{transform_indices = @transform_0, window_bounds = array<i64: 16, 128>}, {transform_indices = @transform_1, window_bounds = array<i64: 16, 128>}, {transform_indices = @transform_2, window_bounds = array<i64: 1, 8, 128>}]} {
    %c0_i32 = arith.constant 0 : i32
    %0 = arith.cmpi eq, %arg1, %c0_i32 : i32
    %1 = arith.extui %0 : i1 to i32
    %c0_i32_0 = arith.constant 0 : i32
    %2 = arith.cmpi ne, %1, %c0_i32_0 : i32
    scf.if %2 {
      %cst_12 = arith.constant 0.000000e+00 : f32
      %19 = vector.broadcast %cst_12 : f32 to vector<1x8x128xf32>
      %c0_13 = arith.constant 0 : index
      %c0_14 = arith.constant 0 : index
      %c0_15 = arith.constant 0 : index
      %20 = vector.load %arg4[%c0_13, %c0_14, %c0_15] : memref<1x8x128xf32, #tpu.memory_space<vmem>>, vector<1x8x128xf32>
      tpu.vector_store %arg4[%c0_13, %c0_14, %c0_15], %19 {strides = array<i32>} : memref<1x8x128xf32, #tpu.memory_space<vmem>>, vector<1x8x128xf32>,
    } else {
    }
    %c0 = arith.constant 0 : index
    %c0_1 = arith.constant 0 : index
    %3 = vector.load %arg2[%c0, %c0_1] : memref<16x128xf32, #tpu.memory_space<vmem>>, vector<16x128xf32>
    %c0_2 = arith.constant 0 : index
    %c0_3 = arith.constant 0 : index
    %4 = vector.load %arg3[%c0_2, %c0_3] : memref<16x128xf32, #tpu.memory_space<vmem>>, vector<16x128xf32>
    %cst = arith.constant 9.900000e+01 : f32
    %5 = vector.broadcast %cst : f32 to vector<16x128xf32>
    %6 = arith.mulf %4, %5 : vector<16x128xf32>
    %cst_4 = arith.constant 1.000000e+00 : f32
    %7 = vector.broadcast %cst_4 : f32 to vector<16x128xf32>
    %8 = arith.addf %6, %7 : vector<16x128xf32>
    %9 = arith.subf %3, %4 : vector<16x128xf32>
    %10 = arith.mulf %9, %9 : vector<16x128xf32>
    %11 = tpu.reciprocal %8 : vector<16x128xf32> -> vector<16x128xf32>
    %12 = arith.mulf %10, %11 : vector<16x128xf32>
    %13 = vector.shape_cast %12 : vector<16x128xf32> to vector<2x8x128xf32>
    %cst_5 = arith.constant dense<0.000000e+00> : vector<8x128xf32>
    %14 = vector.multi_reduction <add>, %13, %cst_5 [0] : vector<2x8x128xf32> to vector<8x128xf32>
    %c0_6 = arith.constant 0 : index
    %c0_7 = arith.constant 0 : index
    %c0_8 = arith.constant 0 : index
    %15 = vector.load %arg4[%c0_6, %c0_7, %c0_8] : memref<1x8x128xf32, #tpu.memory_space<vmem>>, vector<1x8x128xf32>
    %16 = vector.shape_cast %14 : vector<8x128xf32> to vector<1x8x128xf32>
    %17 = arith.addf %15, %16 : vector<1x8x128xf32>
    %c0_9 = arith.constant 0 : index
    %c0_10 = arith.constant 0 : index
    %c0_11 = arith.constant 0 : index
    %18 = vector.load %arg4[%c0_9, %c0_10, %c0_11] : memref<1x8x128xf32, #tpu.memory_space<vmem>>, vector<1x8x128xf32>
    tpu.vector_store %arg4[%c0_9, %c0_10, %c0_11], %17 {strides = array<i32>} : memref<1x8x128xf32, #tpu.memory_space<vmem>>, vector<1x8x128xf32>,
    return
  }
  func.func @transform_0(%arg0: i32, %arg1: i32) -> (i32, i32) {
    %c1_i32 = arith.constant 1 : i32
    %0 = arith.muli %arg0, %c1_i32 : i32
    %1 = arith.addi %0, %arg1 : i32
    %c0_i32 = arith.constant 0 : i32
    %c0_i32_0 = arith.constant 0 : i32
    return %1, %c0_i32 : i32, i32
  }
  func.func @transform_1(%arg0: i32, %arg1: i32) -> (i32, i32) {
    %c1_i32 = arith.constant 1 : i32
    %0 = arith.muli %arg0, %c1_i32 : i32
    %1 = arith.addi %0, %arg1 : i32
    %c0_i32 = arith.constant 0 : i32
    %c0_i32_0 = arith.constant 0 : i32
    return %1, %c0_i32 : i32, i32
  }
  func.func @transform_2(%arg0: i32, %arg1: i32) -> (i32, i32, i32) {
    %c0_i32 = arith.constant 0 : i32
    %c0_i32_0 = arith.constant 0 : i32
    %c0_i32_1 = arith.constant 0 : i32
    return %arg0, %c0_i32, %c0_i32_0 : i32, i32, i32
  }
}

</mosaic_0001>

<bundles_post_ra>
// kernel: tpu_custom_call.1
= control target key start
LH: loop header
LB: loop body
LE: loop exit
PB: predicated region body
PF: predicated region fallthrough
CT: control target
= control target key end

     0   :  { %7 = vsyncpa [#allocation3], 0  ;;  %s231_s0 = inlined_call_operand.hbm [shape: f32[16,128], index: 0, kind: input, shape index: {}]   ;;  %s232_s1 = inlined_call_operand.hbm [shape: f32[16,128], index: 1, kind: input, shape index: {}]   ;;  %s233_s2 = inlined_call_operand.hbm [shape: f32[1,8,128], index: 2, kind: output, shape index: {}]  }
   0x1   :  { %8 = vsyncpa [#allocation6], 0 }
   0x2   :  { %9 = vsyncpa [#allocation4], 0  ;;  %s175_s9 = smov [#allocation2]   ;;  %s103_s13 = scalar_lea.hbm %s231_s0, 256 }
   0x3   :  { %s19_s10 = sshll.u32 %s175_s9, 4  ;;  %p104_p0 = scmp.ne.s32.totalorder %s231_s0, %s103_s13  ;;  %s20_s10 = int_to_ptr.vmem [resolvable:$true] %s19_s10 }
   0x4   :  { %p107_p1 = scmp.lt.u32.totalorder %s103_s13, %s231_s0 }
   0x6   :  { %p109_p2 = pnand %p107_p1, %p104_p0 }
   0x8   :  { %112 = shalt.err (!%p109_p2)
}
   0x9   :  { %s113_s18 = scalar_lea.vmem %s20_s10, 256  ;;  %p118_p4 = scmp.lt.s32.totalorder %s20_s10, %s20_s10 }
   0xa   :  { %p114_p3 = scmp.ne.s32.totalorder %s20_s10, %s113_s18  ;;  %p119_p5 = scmp.lt.s32.totalorder %s113_s18, %s113_s18 }
   0xc   :  { %p120_p6 = por %p119_p5, %p118_p4 }
   0xe   :  { %p121_p7 = pnand %p120_p6, %p114_p3 }
  0x10   :  { %124 = shalt.err (!%p121_p7)
}
  0x11   :  { %s176_s19 = smov 128   ;;  %s177_s20 = smov 8  }
  0x12   :  { %25 = dma.hbm_to_vmem [thread:$0]  %s231_s0, 256, %s20_s10, [#allocation3], %s176_s19, %s176_s19, %s177_s20  }
  0x13   :  { %s178_s23 = smov [#allocation5]   ;;  %s125_s27 = scalar_lea.hbm %s232_s1, 256 }
  0x14   :  { %s35_s24 = sshll.u32 %s178_s23, 4  ;;  %p126_p8 = scmp.ne.s32.totalorder %s232_s1, %s125_s27  ;;  %s36_s24 = int_to_ptr.vmem [resolvable:$true] %s35_s24 }
  0x15   :  { %p129_p9 = scmp.lt.u32.totalorder %s125_s27, %s232_s1 }
  0x17   :  { %p131_p10 = pnand %p129_p9, %p126_p8 }
  0x19   :  { %134 = shalt.err (!%p131_p10)
}
  0x1a   :  { %s135_s4 = scalar_lea.vmem %s36_s24, 256  ;;  %p140_p12 = scmp.lt.s32.totalorder %s36_s24, %s36_s24 }
  0x1b   :  { %p136_p11 = scmp.ne.s32.totalorder %s36_s24, %s135_s4  ;;  %p141_p13 = scmp.lt.s32.totalorder %s135_s4, %s135_s4 }
  0x1d   :  { %p142_p0 = por %p141_p13, %p140_p12 }
  0x1f   :  { %p143_p1 = pnand %p142_p0, %p136_p11 }
  0x21   :  { %146 = shalt.err (!%p143_p1)
}
  0x22   :  { %41 = dma.hbm_to_vmem [thread:$0]  %s232_s1, 256, %s36_s24, [#allocation6], %s176_s19, %s176_s19, %s177_s20  }
  0x23   :  { %169 = dma.done.wait [#allocation3], 256  }
  0x24   :  { %170 = vsyncadd [#allocation3], 4294967040 }
  0x25   :  { %171 = dma.done.wait [#allocation6], 256  }
  0x26   :  { %172 = vsyncadd [#allocation6], 4294967040  ;;  %v59_v0 = vld [vmem:[#allocation5] sm:$0xff]  ;;  %v60_v1 = vld [vmem:[#allocation5 + $0x8] sm:$0xff]  ;;  %s179_s1 = smov [#allocation7]  }
  0x27   :  { %v61_v2 = vmul.f32 99.0, %v59_v0  ;;  %v62_v3 = vmul.f32 99.0, %v60_v1  ;;  %v57_v6 = vld [vmem:[#allocation2] sm:$0xff]  ;;  %v58_v7 = vld [vmem:[#allocation2 + $0x8] sm:$0xff]  ;;  %s83_s6 = sshll.u32 %s179_s1, 4  ;;  %s84_s6 = int_to_ptr.vmem [resolvable:$true] %s83_s6 }
  0x28   :  { %v65_v8 = vsub.f32 %v57_v6, %v59_v0  ;;  %v66_v9 = vsub.f32 %v58_v7, %v60_v1  ;;  %s147_s7 = scalar_lea.vmem %s84_s6, 128  ;;  %p152_p3 = scmp.lt.s32.totalorder %s84_s6, %s84_s6 }
  0x29   :  { %v63_v4 = vadd.f32 1.0, %v61_v2  ;;  %v64_v5 = vadd.f32 1.0, %v62_v3  ;;  %p148_p2 = scmp.ne.s32.totalorder %s84_s6, %s147_s7  ;;  %p153_p4 = scmp.lt.s32.totalorder %s147_s7, %s147_s7 }
  0x2a   :  { %v67_v10 = vmul.f32 %v65_v8, %v65_v8  ;;  %v68_v11 = vmul.f32 %v66_v9, %v66_v9 }
  0x2b   :  { %99 = vrcp.f32 %v63_v4  ;;  %p154_p5 = por %p153_p4, %p152_p3 }
  0x2c   :  { %101 = vrcp.f32 %v64_v5 }
  0x2d   :  { %p155_p6 = pnand %p154_p5, %p148_p2 }
  0x35   :  { %v100_v12 = vpop.eup %99 }
  0x36   :  { %v102_v13 = vpop.eup %101  ;;  %v71_v14 = vmul.f32 %v100_v12, %v67_v10 }
  0x37   :  { %v72_v15 = vmul.f32 %v102_v13, %v68_v11 }
  0x39   :  { %v73_v16 = vadd.f32 %v72_v15, %v71_v14 }
  0x3b   :  { %76 = vst [vmem:[#allocation7] sm:$0xff] %v73_v16 }
  0x3c   :  { %158 = shalt.err (!%p155_p6)
}
  0x3d   :  { %s159_s10 = scalar_lea.hbm %s233_s2, 128 }
  0x3e   :  { %p160_p7 = scmp.ne.s32.totalorder %s233_s2, %s159_s10  ;;  %p163_p8 = scmp.lt.u32.totalorder %s159_s10, %s233_s2 }
  0x40   :  { %p165_p9 = pnand %p163_p8, %p160_p7 }
  0x42   :  { %168 = shalt.err (!%p165_p9)
}
  0x43   :  { %86 = dma.vmem_to_hbm [thread:$0]  %s84_s6, 128, %s233_s2, [#allocation4]  }
  0x44   :  { %173 = dma.done.wait [#allocation4], 128  }
  0x45   :  { %174 = vsyncadd [#allocation4], 4294967168 }
  0x46   :  { %90 = vsyncpa [#allocation3], 1 }
  0x47   :  { %91 = vsyncpa [#allocation6], 1 }
  0x48   :  { %92 = vsyncpa [#allocation4], 1 }

</bundles_post_ra>
